<compile_context>
chip_gen: v7x
topology: tpu7x:2x2x1
jax: 0.10.0
libtpu: 0.0.40
codegen_flags: <defaults>
</compile_context>

<pallas_src>
import jax
import jax.numpy as jnp
from jax.experimental import pallas as pl
from jax.experimental.pallas import tpu as pltpu  # noqa: F401  (TPU backend)


_BN_EPS = 1e-5


def _round_up(x, m):
    return ((x + m - 1) // m) * m


def _full_spec(shape):
    # Tiny problem: full-array blocks, single grid point (grid = ()).
    return pl.BlockSpec(shape, lambda: tuple(0 for _ in shape))


# ---------------------------------------------------------------------------
# Fused whole-network kernel (generated per network topology)
# ---------------------------------------------------------------------------
def _make_fused_mlp_kernel(n_hidden, batch):
    """Kernel ref layout (all 2-D):
        refs = ( y,                              # (B, F0)           f32
                 (w, gamma, beta) * n_hidden,    # (k_i, out_pad_i) bf16, (1, out_pad_i) f32 x2
                 w_last, b_last,                 # (k_L, out) f32, (1, out) f32
                 o )                             # (B, out)           f32
    Hidden-layer biases are folded away (exact under train-mode BatchNorm).
    """
    inv_b = 1.0 / float(batch)

    def kernel(*refs):
        idx = 0
        y_ref = refs[idx]; idx += 1
        out = y_ref[...]                                     # (B, F0) f32

        # ---- hidden layers: bf16 matmul -> BN(batch stats) -> ReLU ----
        for _ in range(n_hidden):
            w_ref, g_ref, beta_ref = refs[idx], refs[idx + 1], refs[idx + 2]
            idx += 3
            k = w_ref.shape[0]                               # contraction width
            a = out[:, :k].astype(jnp.bfloat16)              # zero-padded cols beyond
            z = jnp.dot(a, w_ref[...], preferred_element_type=jnp.float32)

            # Batch statistics via sum / sum-of-squares, folded to scale/shift.
            s1 = jnp.sum(z, axis=0, keepdims=True)
            s2 = jnp.sum(z * z, axis=0, keepdims=True)
            mean = s1 * inv_b
            var = jnp.maximum(s2 * inv_b - mean * mean, 0.0)
            inv_std = jax.lax.rsqrt(var + _BN_EPS)
            scale = g_ref[...] * inv_std                     # 0 on padded columns
            shift = beta_ref[...] - mean * scale
            out = jnp.maximum(z * scale + shift, 0.0)        # padded cols stay 0

        # ---- final linear (f32, bias, no BN / ReLU) ----
        w_ref, b_ref = refs[idx], refs[idx + 1]; idx += 2
        o_ref = refs[idx]
        k = w_ref.shape[0]
        z = jnp.dot(out[:, :k], w_ref[...],
                    preferred_element_type=jnp.float32) + b_ref[...]
        o_ref[...] = z.astype(o_ref.dtype)

    return kernel


# ---------------------------------------------------------------------------
# Parameter init (mimics PyTorch defaults) + kernel-side layouts
# ---------------------------------------------------------------------------
def init_backward_params(key, layer_sizes):
    """Linear: U(-1/sqrt(in), 1/sqrt(in)); BatchNorm1d: gamma=1, beta=0.
    Stores raw f32 tensors (pure-JAX reference) and kernel-side layouts:
      hidden:  w (k_dim, round_up(out,128)) bf16, gamma/beta (1, round_up(out,128)) f32
      final :  w (k_dim, out) f32, bias (1, out) f32
    k_dim = in_size for the first layer, round_up(in_size, 8) afterwards."""
    params = []
    n_layers = len(layer_sizes) - 1
    for i in range(n_layers):
        in_size, out_size = layer_sizes[i], layer_sizes[i + 1]
        is_last = i == n_layers - 1

        kw, kb = jax.random.split(jax.random.fold_in(key, i))
        bound = 1.0 / (in_size ** 0.5)
        w = jax.random.uniform(kw, (out_size, in_size), jnp.float32, -bound, bound)
        b = jax.random.uniform(kb, (out_size,), jnp.float32, -bound, bound)
        gamma = jnp.ones((out_size,), jnp.float32)
        beta = jnp.zeros((out_size,), jnp.float32)

        w_t = w.T                                            # (in, out)
        k_dim = in_size if i == 0 else _round_up(in_size, 8)

        p = dict(
            in_size=in_size, out_size=out_size,
            # raw (reference)
            w_t=w_t, b=b.reshape(1, out_size),
            gamma=gamma.reshape(1, out_size), beta=beta.reshape(1, out_size),
        )
        if is_last:
            w_pad = jnp.zeros((k_dim, out_size), jnp.float32)
            w_pad = w_pad.at[:in_size, :].set(w_t)
            p.update(w_pad=w_pad, b_pad=b.reshape(1, out_size))
        else:
            out_pad = _round_up(out_size, 128)
            w_pad = jnp.zeros((k_dim, out_pad), jnp.bfloat16)
            w_pad = w_pad.at[:in_size, :out_size].set(w_t.astype(jnp.bfloat16))
            gamma_pad = jnp.zeros((1, out_pad), jnp.float32).at[0, :out_size].set(gamma)
            beta_pad = jnp.zeros((1, out_pad), jnp.float32).at[0, :out_size].set(beta)
            p.update(w_pad=w_pad, gamma_pad=gamma_pad, beta_pad=beta_pad)
        params.append(p)
    return params


# ---------------------------------------------------------------------------
# Forward: one fused pallas_call for the whole network, no wrapper pad/slice
# ---------------------------------------------------------------------------
def backward_forward(y, params):
    B, F0 = y.shape
    assert F0 == params[0]["in_size"]
    out_size = params[-1]["out_size"]
    n_hidden = len(params) - 1

    inputs = [y]
    for p in params[:-1]:
        inputs += [p["w_pad"], p["gamma_pad"], p["beta_pad"]]
    inputs += [params[-1]["w_pad"], params[-1]["b_pad"]]

    in_specs = [_full_spec(tuple(a.shape)) for a in inputs]

    flops = sum(2 * B * p["w_pad"].shape[0] * p["w_pad"].shape[1] for p in params)
    bytes_accessed = (sum(int(a.size) * a.dtype.itemsize for a in inputs)
                      + B * out_size * 4)
    transcendentals = sum(p["w_pad"].shape[1] for p in params[:-1])  # rsqrt per BN col
    cost = pl.CostEstimate(flops=flops, transcendentals=transcendentals,
                           bytes_accessed=bytes_accessed)

    kernel = _make_fused_mlp_kernel(n_hidden, B)
    return pl.pallas_call(
        kernel,
        out_shape=jax.ShapeDtypeStruct((B, out_size), jnp.float32),
        in_specs=in_specs,
        out_specs=_full_spec((B, out_size)),
        cost_estimate=cost,
    )(*inputs)


# ---------------------------------------------------------------------------
# Pure-JAX reference (mirrors the PyTorch module, f32, incl. hidden biases)
# ---------------------------------------------------------------------------
def backward_forward_ref(y, params):
    out = y
    for p in params[:-1]:
        z = out @ p["w_t"] + p["b"]
        mean = jnp.mean(z, axis=0, keepdims=True)
        var = jnp.mean((z - mean) ** 2, axis=0, keepdims=True)
        z = p["gamma"] * (z - mean) / jnp.sqrt(var + _BN_EPS) + p["beta"]
        out = jnp.maximum(z, 0.0)
    p = params[-1]
    return out @ p["w_t"] + p["b"]


if __name__ == "__main__":
    key = jax.random.PRNGKey(0)
    layer_sizes = [32, 64, 48, 16]   # maps "output" y back to "input" x
    batch = 8

    k_in, k_param = jax.random.split(key)
    y = jax.random.normal(k_in, (batch, layer_sizes[0]), jnp.float32)
    params = init_backward_params(k_param, layer_sizes)

    out = backward_forward(y, params)
    out = jax.block_until_ready(out)

    ref = backward_forward_ref(y, params)
    assert out.shape == (batch, layer_sizes[-1])
    # bf16 hidden-layer weights => relaxed tolerance vs. the f32 reference.
    assert jnp.allclose(out, ref, atol=5e-2, rtol=5e-2), (
        "mismatch vs reference, max abs err = %g" % float(jnp.max(jnp.abs(out - ref))))

    print("KERNEL_OK")
</pallas_src>

<mosaic_0001>
module attributes {stable_mosaic.version = 11 : i64} {
  func.func @kernel(%arg0: memref<8x32xf32, #tpu.memory_space<vmem>>, %arg1: memref<32x128xbf16, #tpu.memory_space<vmem>>, %arg2: memref<1x128xf32, #tpu.memory_space<vmem>>, %arg3: memref<1x128xf32, #tpu.memory_space<vmem>>, %arg4: memref<64x128xbf16, #tpu.memory_space<vmem>>, %arg5: memref<1x128xf32, #tpu.memory_space<vmem>>, %arg6: memref<1x128xf32, #tpu.memory_space<vmem>>, %arg7: memref<48x16xf32, #tpu.memory_space<vmem>>, %arg8: memref<1x16xf32, #tpu.memory_space<vmem>>, %arg9: memref<8x16xf32, #tpu.memory_space<vmem>>) attributes {dimension_semantics = [], scalar_prefetch = 0 : i64, scratch_operands = 0 : i64, tpu.core_type = #tpu.core_type<tc>} {
    %c0 = arith.constant 0 : index
    %c0_0 = arith.constant 0 : index
    %0 = vector.load %arg0[%c0, %c0_0] : memref<8x32xf32, #tpu.memory_space<vmem>>, vector<8x32xf32>
    %1 = arith.truncf %0 : vector<8x32xf32> to vector<8x32xbf16>
    %c0_1 = arith.constant 0 : index
    %c0_2 = arith.constant 0 : index
    %2 = vector.load %arg1[%c0_1, %c0_2] : memref<32x128xbf16, #tpu.memory_space<vmem>>, vector<32x128xbf16>
    %cst = arith.constant dense<0.000000e+00> : vector<8x128xf32>
    %3 = tpu.matmul %1, %2, %cst {dimension_numbers = #tpu.dot_dimension_numbers<[1], [0], [0], [1], [0, 0, 1, 1], [], []>} : vector<8x32xbf16>, vector<32x128xbf16>, vector<8x128xf32> -> vector<8x128xf32>
    %cst_3 = arith.constant dense<0.000000e+00> : vector<128xf32>
    %4 = vector.multi_reduction <add>, %3, %cst_3 [0] : vector<8x128xf32> to vector<128xf32>
    %5 = vector.shape_cast %4 : vector<128xf32> to vector<1x128xf32>
    %6 = arith.mulf %3, %3 : vector<8x128xf32>
    %cst_4 = arith.constant dense<0.000000e+00> : vector<128xf32>
    %7 = vector.multi_reduction <add>, %6, %cst_4 [0] : vector<8x128xf32> to vector<128xf32>
    %8 = vector.shape_cast %7 : vector<128xf32> to vector<1x128xf32>
    %cst_5 = arith.constant 1.250000e-01 : f32
    %9 = vector.broadcast %cst_5 : f32 to vector<1x128xf32>
    %10 = arith.mulf %5, %9 : vector<1x128xf32>
    %cst_6 = arith.constant 1.250000e-01 : f32
    %11 = vector.broadcast %cst_6 : f32 to vector<1x128xf32>
    %12 = arith.mulf %8, %11 : vector<1x128xf32>
    %13 = arith.mulf %10, %10 : vector<1x128xf32>
    %14 = arith.subf %12, %13 : vector<1x128xf32>
    %cst_7 = arith.constant 0.000000e+00 : f32
    %15 = vector.broadcast %cst_7 : f32 to vector<1x128xf32>
    %16 = arith.maximumf %14, %15 : vector<1x128xf32>
    %cst_8 = arith.constant 9.99999974E-6 : f32
    %17 = vector.broadcast %cst_8 : f32 to vector<1x128xf32>
    %18 = arith.addf %16, %17 : vector<1x128xf32>
    %19 = math.rsqrt %18 : vector<1x128xf32>
    %c0_9 = arith.constant 0 : index
    %c0_10 = arith.constant 0 : index
    %20 = vector.load %arg2[%c0_9, %c0_10] : memref<1x128xf32, #tpu.memory_space<vmem>>, vector<1x128xf32>
    %21 = arith.mulf %20, %19 : vector<1x128xf32>
    %c0_11 = arith.constant 0 : index
    %c0_12 = arith.constant 0 : index
    %22 = vector.load %arg3[%c0_11, %c0_12] : memref<1x128xf32, #tpu.memory_space<vmem>>, vector<1x128xf32>
    %23 = arith.mulf %10, %21 : vector<1x128xf32>
    %24 = arith.subf %22, %23 : vector<1x128xf32>
    %25 = vector.broadcast %21 : vector<1x128xf32> to vector<8x128xf32>
    %26 = arith.mulf %3, %25 : vector<8x128xf32>
    %27 = vector.broadcast %24 : vector<1x128xf32> to vector<8x128xf32>
    %28 = arith.addf %26, %27 : vector<8x128xf32>
    %cst_13 = arith.constant 0.000000e+00 : f32
    %29 = vector.broadcast %cst_13 : f32 to vector<8x128xf32>
    %30 = arith.maximumf %28, %29 : vector<8x128xf32>
    %31 = vector.extract_strided_slice %30 {offsets = [0, 0], sizes = [8, 64], strides = [1, 1]} : vector<8x128xf32> to vector<8x64xf32>
    %32 = arith.truncf %31 : vector<8x64xf32> to vector<8x64xbf16>
    %c0_14 = arith.constant 0 : index
    %c0_15 = arith.constant 0 : index
    %33 = vector.load %arg4[%c0_14, %c0_15] : memref<64x128xbf16, #tpu.memory_space<vmem>>, vector<64x128xbf16>
    %cst_16 = arith.constant dense<0.000000e+00> : vector<8x128xf32>
    %34 = tpu.matmul %32, %33, %cst_16 {dimension_numbers = #tpu.dot_dimension_numbers<[1], [0], [0], [1], [0, 0, 1, 1], [], []>} : vector<8x64xbf16>, vector<64x128xbf16>, vector<8x128xf32> -> vector<8x128xf32>
    %cst_17 = arith.constant dense<0.000000e+00> : vector<128xf32>
    %35 = vector.multi_reduction <add>, %34, %cst_17 [0] : vector<8x128xf32> to vector<128xf32>
    %36 = vector.shape_cast %35 : vector<128xf32> to vector<1x128xf32>
    %37 = arith.mulf %34, %34 : vector<8x128xf32>
    %cst_18 = arith.constant dense<0.000000e+00> : vector<128xf32>
    %38 = vector.multi_reduction <add>, %37, %cst_18 [0] : vector<8x128xf32> to vector<128xf32>
    %39 = vector.shape_cast %38 : vector<128xf32> to vector<1x128xf32>
    %cst_19 = arith.constant 1.250000e-01 : f32
    %40 = vector.broadcast %cst_19 : f32 to vector<1x128xf32>
    %41 = arith.mulf %36, %40 : vector<1x128xf32>
    %cst_20 = arith.constant 1.250000e-01 : f32
    %42 = vector.broadcast %cst_20 : f32 to vector<1x128xf32>
    %43 = arith.mulf %39, %42 : vector<1x128xf32>
    %44 = arith.mulf %41, %41 : vector<1x128xf32>
    %45 = arith.subf %43, %44 : vector<1x128xf32>
    %cst_21 = arith.constant 0.000000e+00 : f32
    %46 = vector.broadcast %cst_21 : f32 to vector<1x128xf32>
    %47 = arith.maximumf %45, %46 : vector<1x128xf32>
    %cst_22 = arith.constant 9.99999974E-6 : f32
    %48 = vector.broadcast %cst_22 : f32 to vector<1x128xf32>
    %49 = arith.addf %47, %48 : vector<1x128xf32>
    %50 = math.rsqrt %49 : vector<1x128xf32>
    %c0_23 = arith.constant 0 : index
    %c0_24 = arith.constant 0 : index
    %51 = vector.load %arg5[%c0_23, %c0_24] : memref<1x128xf32, #tpu.memory_space<vmem>>, vector<1x128xf32>
    %52 = arith.mulf %51, %50 : vector<1x128xf32>
    %c0_25 = arith.constant 0 : index
    %c0_26 = arith.constant 0 : index
    %53 = vector.load %arg6[%c0_25, %c0_26] : memref<1x128xf32, #tpu.memory_space<vmem>>, vector<1x128xf32>
    %54 = arith.mulf %41, %52 : vector<1x128xf32>
    %55 = arith.subf %53, %54 : vector<1x128xf32>
    %56 = vector.broadcast %52 : vector<1x128xf32> to vector<8x128xf32>
    %57 = arith.mulf %34, %56 : vector<8x128xf32>
    %58 = vector.broadcast %55 : vector<1x128xf32> to vector<8x128xf32>
    %59 = arith.addf %57, %58 : vector<8x128xf32>
    %cst_27 = arith.constant 0.000000e+00 : f32
    %60 = vector.broadcast %cst_27 : f32 to vector<8x128xf32>
    %61 = arith.maximumf %59, %60 : vector<8x128xf32>
    %62 = vector.extract_strided_slice %61 {offsets = [0, 0], sizes = [8, 48], strides = [1, 1]} : vector<8x128xf32> to vector<8x48xf32>
    %c0_28 = arith.constant 0 : index
    %c0_29 = arith.constant 0 : index
    %63 = vector.load %arg7[%c0_28, %c0_29] : memref<48x16xf32, #tpu.memory_space<vmem>>, vector<48x16xf32>
    %cst_30 = arith.constant dense<0.000000e+00> : vector<8x16xf32>
    %64 = tpu.matmul %62, %63, %cst_30 {dimension_numbers = #tpu.dot_dimension_numbers<[1], [0], [0], [1], [0, 0, 1, 1], [], []>} : vector<8x48xf32>, vector<48x16xf32>, vector<8x16xf32> -> vector<8x16xf32>
    %c0_31 = arith.constant 0 : index
    %c0_32 = arith.constant 0 : index
    %65 = vector.load %arg8[%c0_31, %c0_32] : memref<1x16xf32, #tpu.memory_space<vmem>>, vector<1x16xf32>
    %66 = vector.broadcast %65 : vector<1x16xf32> to vector<8x16xf32>
    %67 = arith.addf %64, %66 : vector<8x16xf32>
    %c0_33 = arith.constant 0 : index
    %c0_34 = arith.constant 0 : index
    %68 = vector.load %arg9[%c0_33, %c0_34] : memref<8x16xf32, #tpu.memory_space<vmem>>, vector<8x16xf32>
    tpu.vector_store %arg9[%c0_33, %c0_34], %67 {strides = array<i32>} : memref<8x16xf32, #tpu.memory_space<vmem>>, vector<8x16xf32>,
    return
  }
}

</mosaic_0001>

<bundles_post_ra>
// kernel: tpu_custom_call.1
= control target key start
LH: loop header
LB: loop body
LE: loop exit
PB: predicated region body
PF: predicated region fallthrough
CT: control target
= control target key end

     0   :  { %v463_v1 = vmov 0.0   ;;  %vm464_vm0 = vmmov 0   ;;  %s583_s0 = inlined_call_operand.vmem [shape: f32[8,32], index: 0, kind: input, shape index: {}]   ;;  %s584_s1 = inlined_call_operand.vmem [shape: bf16[32,128], index: 1, kind: input, shape index: {}]   ;;  %s585_s2 = inlined_call_operand.vmem [shape: f32[1,128], index: 2, kind: input, shape index: {}]   ;;  %s586_s3 = inlined_call_operand.vmem [shape: f32[1,128], index: 3, kind: input, shape index: {}]   ;;  %s587_s4 = inlined_call_operand.vmem [shape: bf16[64,128], index: 4, kind: input, shape index: {}]   ;;  %s588_s5 = inlined_call_operand.vmem [shape: f32[1,128], index: 5, kind: input, shape index: {}]   ;;  %s589_s6 = inlined_call_operand.vmem [shape: f32[1,128], index: 6, kind: input, shape index: {}]   ;;  %s590_s7 = inlined_call_operand.vmem [shape: f32[48,16], index: 7, kind: input, shape index: {}]   ;;  %s591_s8 = inlined_call_operand.vmem [shape: f32[1,16], index: 8, kind: input, shape index: {}]   ;;  %s592_s9 = inlined_call_operand.hbm [shape: f32[8,16], index: 9, kind: output, shape index: {}]  }
   0x1   :  { %v429_v0 = vld [vmem:[%s584_s1] sm:$0xff]   ;;  %381 = vmatprep.subr.bf16.mxu0 %v463_v1  ;;  %v430_v2 = vld [vmem:[%s584_s1 + $0x8] sm:$0xff]   ;;  %389 = vmatprep.subr.bf16.mxu1 %v463_v1 }
   0x2   :  { %382 = vmatpush3.bf16.msra.mxu0 %v429_v0  ;;  %385 = vmatprep.mubr.msk.bf16.mxu0 %vm464_vm0, %v463_v1  ;;  %v34_v3 = vld [vmem:[%s583_s0] sm:$0xff] }
   0x3   :  { %383 = vmatprep.subr.bf16.mxu0 %v463_v1  ;;  %397 = vmatprep.mubr.msk.bf16.mxu1 %vm464_vm0, %v463_v1  ;;  %v35_v4 = vpack.c.bf16 %v34_v3, %v34_v3 }
   0x4   :  { %14 = vsyncpa [#allocation3], 0  ;;  %vm52_vm1 = vcmask 261120   ;;  %v431_v5 = vld [vmem:[%s587_s4] sm:$0xff]   ;;  %v432_v6 = vld [vmem:[%s587_s4 + $0x8] sm:$0xff]   ;;  %v122_v32 = vlaneseq  ;;  %vm169_vm2 = vcmask 523264  }
   0x5   :  { %390 = vmatpush3.bf16.msra.mxu1 %v431_v5  ;;  %v433_v7 = vld [vmem:[%s587_s4 + $0x10] sm:$0xff]   ;;  %v434_v8 = vld [vmem:[%s587_s4 + $0x18] sm:$0xff]   ;;  %v116_v34 = vld [vmem:[%s585_s2] sm:$0x1]  ;;  %v465_v50 = vmov 0.0|0.0   ;;  %vm266_vm3 = vcmask 392192  }
   0x6   :  { %384 = vmatpush3.bf16.msra.mxu0 %v430_v2  ;;  %391 = vmatprep.subr.bf16.mxu1 %v463_v1  ;;  %v123_v33 = vshrl.u32 %v122_v32, 7  ;;  %v118_v38 = vld [vmem:[%s586_s3] sm:$0x1]  ;;  %v254_v48 = vld [vmem:[%s590_s7 + $0x8] sm:$0xff]  ;;  %v255_v51 = vld [vmem:[%s590_s7 + $0x10] sm:$0xff]  ;;  %vm340_vm4 = vcmask 130048  }
   0x7   :  { %v253_v47 = vld [vmem:[%s590_s7] sm:$0xff]  ;;  %416 = vmatprep.subr.bf16.mxu0 %v465_v50  ;;  %v256_v52 = vld [vmem:[%s590_s7 + $0x18] sm:$0xff]  ;;  %v258_v55 = vld [vmem:[%s590_s7 + $0x28] sm:$0xff] }
   0x8   :  { %v124_v35 = vsub.s32 0, %v123_v33  ;;  %v417_v49 = vpack.c.bf16 %v254_v48, %v253_v47  ;;  %v420_v53 = vpack.c.bf16 %v256_v52, %v255_v51  ;;  %v257_v54 = vld [vmem:[%s590_s7 + $0x20] sm:$0xff] }
   0x9   :  { %386 = vmatmul.mubr.msk.bf16.vlgmr.msra.gmra.mrb[0].mxu0 %vm52_vm1, %v35_v4  ;;  %392 = vmatpush3.bf16.msra.mxu1 %v432_v6  ;;  %v423_v56 = vpack.c.bf16 %v258_v55, %v257_v54 }
   0xa   :  { %413 = vmatprep.mubr.msk.f32.mxu0 %vm464_vm0, %v463_v1  ;;  %393 = vmatprep.subr.bf16.mxu1 %v463_v1 }
   0xb   :  { %418 = vmatpush3.bf16.msra.mxu0 %v417_v49 }
   0xc   :  { %419 = vmatprep.subr.bf16.mxu0 %v465_v50 }
   0xd   :  { %394 = vmatpush3.bf16.msra.mxu1 %v433_v7 }
   0xe   :  { %395 = vmatprep.subr.bf16.mxu1 %v463_v1 }
   0xf   :  { %421 = vmatpush3.bf16.msra.mxu0 %v420_v53 }
  0x10   :  { %422 = vmatprep.subr.bf16.mxu0 %v465_v50 }
  0x11   :  { %396 = vmatpush3.bf16.msra.mxu1 %v434_v8 }
  0x13   :  { %424 = vmatpush3.bf16.msra.mxu0 %v423_v56 }
  0xdc   :  { %v90_v9 = vpop.f32.mrb[0].mxu0 }
  0xdd   :  { %v96_v10 = vrot.slane %v90_v9, 4  ;;  %v102_v11 = vmul.f32 %v90_v9, %v90_v9  ;;  %v387_v12 = vpop.f32.mrb[1].mxu0 }
  0xde   :  { %v93_v13 = vpop.f32.mrb[2].mxu0 }
  0xdf   :  { %v97_v14 = vadd.f32 %v96_v10, %v90_v9  ;;  %v103_v15 = vrot.slane %v102_v11, 4  ;;  %v388_v16 = vpop.f32.mrb[3].mxu0 }
  0xe0   :  { %v233_v16 = vld [vmem:[%s588_s5] sm:$0x1]  ;;  %s466_s5 = smov [#allocation2]  }
  0xe1   :  { %v98_v17 = vrot.slane %v97_v14, 2  ;;  %v104_v18 = vadd.f32 %v103_v15, %v102_v11  ;;  %s348_s17 = sshll.u32 %s466_s5, 4  ;;  %s349_s17 = int_to_ptr.vmem [resolvable:$true] %s348_s17 }
  0xe2   :  { %p444_p1 = scmp.lt.s32.totalorder %s349_s17, %s349_s17 }
  0xe3   :  { %v99_v19 = vadd.f32 %v98_v17, %v97_v14  ;;  %v105_v20 = vrot.slane %v104_v18, 2 }
  0xe5   :  { %v100_v21 = vrot.slane %v99_v19, 1  ;;  %v106_v22 = vadd.f32 %v105_v20, %v104_v18 }
  0xe7   :  { %v101_v23 = vadd.f32 %v100_v21, %v99_v19  ;;  %v107_v24 = vrot.slane %v106_v22, 1  ;;  %v235_v19 = vld [vmem:[%s589_s6] sm:$0x1]  ;;  %s439_s6 = scalar_lea.vmem %s349_s17, 128 }
  0xe8   :  { %p440_p0 = scmp.ne.s32.totalorder %s349_s17, %s439_s6  ;;  %p445_p2 = scmp.lt.s32.totalorder %s439_s6, %s439_s6 }
  0xe9   :  { %v108_v25 = vadd.f32 %v107_v24, %v106_v22  ;;  %v109_v26 = vmul.f32 0.125, %v101_v23 }
  0xea   :  { %p446_p3 = por %p445_p2, %p444_p1 }
  0xeb   :  { %v110_v27 = vmul.f32 0.125, %v108_v25  ;;  %v111_v28 = vmul.f32 %v109_v26, %v109_v26 }
  0xec   :  { %p447_p4 = pnand %p446_p3, %p440_p0 }
  0xed   :  { %v112_v29 = vsub.f32 %v110_v27, %v111_v28  ;;  %v364_v27 = vld [vmem:[%s591_s8] ss:$0 sm:$0xff] }
  0xef   :  { %v113_v30 = vmax.f32 %v112_v29, 0.0 }
  0xf1   :  { %v114_v31 = vadd.f32 1e-05, %v113_v30 }
  0xf3   :  { %435 = vrsqrt.f32 %v114_v31 }
  0xfd   :  { %v436_v36 = vpop.eup %435 }
  0xfe   :  { %v117_v37 = vmul.f32 %v436_v36, %v116_v34 }
 0x100   :  { %v119_v39 = vmul.f32 %v117_v37, %v109_v26  ;;  %v125_v40 = vrot.slane %v117_v37, %v124_v35 }
 0x102   :  { %v120_v41 = vsub.f32 %v118_v38, %v119_v39  ;;  %v127_v42 = vmul.f32 %v125_v40, %v90_v9 }
 0x104   :  { %v132_v43 = vrot.slane %v120_v41, %v124_v35 }
 0x106   :  { %v134_v44 = vadd.f32 %v132_v43, %v127_v42 }
 0x108   :  { %v135_v45 = vmax.f32 %v134_v44, 0.0 }
 0x10a   :  { %v136_v46 = vpack.c.bf16 %v135_v45, %v135_v45 }
 0x10c   :  { %398 = vmatmul.mubr.msk.bf16.vlgmr.msra.gmra.mrb[0].mxu1 %vm169_vm2, %v136_v46 }
 0x1df   :  { %v207_v57 = vpop.f32.mrb[0].mxu1 }
 0x1e0   :  { %v213_v58 = vrot.slane %v207_v57, 4  ;;  %v219_v59 = vmul.f32 %v207_v57, %v207_v57  ;;  %v399_v60 = vpop.f32.mrb[1].mxu1 }
 0x1e1   :  { %v210_v61 = vpop.f32.mrb[2].mxu1 }
 0x1e2   :  { %v214_v62 = vadd.f32 %v213_v58, %v207_v57  ;;  %v220_v63 = vrot.slane %v219_v59, 4  ;;  %v400_v0 = vpop.f32.mrb[3].mxu1 }
 0x1e4   :  { %v215_v1 = vrot.slane %v214_v62, 2  ;;  %v221_v2 = vadd.f32 %v220_v63, %v219_v59 }
 0x1e6   :  { %v216_v3 = vadd.f32 %v215_v1, %v214_v62  ;;  %v222_v4 = vrot.slane %v221_v2, 2 }
 0x1e8   :  { %v217_v5 = vrot.slane %v216_v3, 1  ;;  %v223_v6 = vadd.f32 %v222_v4, %v221_v2 }
 0x1ea   :  { %v218_v7 = vadd.f32 %v217_v5, %v216_v3  ;;  %v224_v8 = vrot.slane %v223_v6, 1 }
 0x1ec   :  { %v225_v9 = vadd.f32 %v224_v8, %v223_v6  ;;  %v226_v10 = vmul.f32 0.125, %v218_v7 }
 0x1ee   :  { %v227_v11 = vmul.f32 0.125, %v225_v9  ;;  %v228_v12 = vmul.f32 %v226_v10, %v226_v10 }
 0x1f0   :  { %v229_v13 = vsub.f32 %v227_v11, %v228_v12 }
 0x1f2   :  { %v230_v14 = vmax.f32 %v229_v13, 0.0 }
 0x1f4   :  { %v231_v15 = vadd.f32 1e-05, %v230_v14 }
 0x1f6   :  { %437 = vrsqrt.f32 %v231_v15 }
 0x200   :  { %v438_v17 = vpop.eup %437 }
 0x201   :  { %v234_v18 = vmul.f32 %v438_v17, %v233_v16 }
 0x203   :  { %v236_v20 = vmul.f32 %v234_v18, %v226_v10  ;;  %v242_v21 = vrot.slane %v234_v18, %v124_v35 }
 0x205   :  { %v237_v22 = vsub.f32 %v235_v19, %v236_v20  ;;  %v244_v23 = vmul.f32 %v242_v21, %v207_v57 }
 0x207   :  { %v249_v24 = vrot.slane %v237_v22, %v124_v35 }
 0x209   :  { %v251_v25 = vadd.f32 %v249_v24, %v244_v23 }
 0x20b   :  { %v252_v26 = vmax.f32 %v251_v25, 0.0 }
 0x20d   :  { %414 = vmatmul.mubr.msk.f32.vlgmr.msra.gmra.mrb[4].mxu0 %vm266_vm3, %v252_v26 }
 0x2e0   :  { %v336_v28 = vpop.f32.mrb[4].mxu0 }
 0x2e1   :  { %v337_v29 = vadd.f32 %v364_v27, %v336_v28  ;;  %v415_v30 = vpop.f32.mrb[5].mxu0 }
 0x2e3   :  { %341 = vst.msk [vmem:[#allocation2] sm:$0xff] %vm340_vm4, %v337_v29 }
 0x2e4   :  { %450 = shalt.err (!%p447_p4)
}
 0x2e5   :  { %s451_s19 = scalar_lea.hbm %s592_s9, 128 }
 0x2e6   :  { %p452_p5 = scmp.ne.s32.totalorder %s592_s9, %s451_s19  ;;  %p455_p6 = scmp.lt.u32.totalorder %s451_s19, %s592_s9 }
 0x2e8   :  { %p457_p7 = pnand %p455_p6, %p452_p5 }
 0x2ea   :  { %460 = shalt.err (!%p457_p7)
}
 0x2eb   :  { %351 = dma.vmem_to_hbm [thread:$0]  %s349_s17, 128, %s592_s9, [#allocation3]  }
 0x2ec   :  { %461 = dma.done.wait [#allocation3], 128  }
 0x2ed   :  { %462 = vsyncadd [#allocation3], 4294967168 }
 0x2ee   :  { %355 = vsyncpa [#allocation3], 1 }

</bundles_post_ra>
